<compile_context>
chip_gen: v7x
topology: tpu7x:2x2x1
jax: 0.10.0
libtpu: 0.0.40
codegen_flags: <defaults>
</compile_context>

<pallas_src>
import functools
import math

import jax
import jax.numpy as jnp
from jax import lax
from jax.experimental import pallas as pl
from jax.experimental.pallas import tpu as pltpu

# --- small config (consistent with a BertConfig) ---
B = 2          # batch
S = 8          # sequence length
H = 32         # hidden size
NH = 4         # num attention heads
HS = H // NH   # head size
I = 64         # intermediate (MLP) size
LN_EPS = 1e-12
NK = NH * B * S            # score columns: (head, batch, key) = 64

# --- packed parameter slab layout (one DMA for all params + constants) ------
SLAB_LANES = 128


def _r8(n):
    return (n + 7) // 8 * 8


_SLAB_FIELDS = (
    ("wqkv",   (H, 3 * H)),     # fused QKV weights, (in, out); Q pre-scaled
    ("bqkv",   (1, 3 * H)),
    ("wo",     (H, H)),         # output projection, (in, out)
    ("w1",     (H, I)),
    ("b1",     (1, I)),
    ("w2",     (I, H)),
    ("bo",     (1, H)),
    ("g1",     (1, H)),
    ("be1",    (1, H)),
    ("b2",     (1, H)),
    ("g2",     (1, H)),
    ("be2",    (1, H)),
    ("headm",  (NK, H)),        # block-diagonal head mask for K/V packing
    ("segsum", (NK, NK)),       # per-(head,batch) segment summation matrix
    ("sameb",  (B * S, NK)),    # same-batch 0/1 mask for score columns
)
_SLAB_SHAPE = dict(_SLAB_FIELDS)
_SLAB_OFF = {}
_row = 0
for _name, (_rows, _cols) in _SLAB_FIELDS:
    _SLAB_OFF[_name] = _row        # every field starts on an 8-aligned row
    _row += _r8(_rows)
SLAB_ROWS = _row                   # 368 rows x 128 lanes x f32 ~= 184 KiB


def pack_bert_block_params(params):
    """One-time host-side packing (done once at model load in practice)."""
    (wq, bq, wk, bk, wv, bv, wo, bo, g1, be1, w1, b1, w2, b2, g2, be2) = params
    inv = jnp.float32(1.0 / math.sqrt(HS))

    # Static restructuring constants; column index c = h*(B*S) + b*S + s.
    col = jnp.arange(NK)
    head = col // (B * S)
    bat = (col % (B * S)) // S
    headm = (head[:, None] == (jnp.arange(H)[None, :] // HS)).astype(jnp.float32)
    segsum = ((col[:, None] // S) == (col[None, :] // S)).astype(jnp.float32)
    sameb = ((jnp.arange(B * S)[:, None] // S) == bat[None, :]).astype(jnp.float32)

    fields = {
        "wqkv": jnp.concatenate([wq.T * inv, wk.T, wv.T], axis=1),  # (H, 3H)
        "bqkv": jnp.concatenate([bq * inv, bk, bv], axis=1),        # (1, 3H)
        "wo": wo.T, "w1": w1.T, "b1": b1, "w2": w2.T,
        "bo": bo, "g1": g1, "be1": be1, "b2": b2, "g2": g2, "be2": be2,
        "headm": headm, "segsum": segsum, "sameb": sameb,
    }
    slab = jnp.zeros((SLAB_ROWS, SLAB_LANES), jnp.float32)
    for name, (rows, cols) in _SLAB_FIELDS:
        a = jnp.asarray(fields[name], jnp.float32).reshape(rows, cols)
        slab = slab.at[_SLAB_OFF[name]:_SLAB_OFF[name] + rows, 0:cols].set(a)
    return slab


def _layer_norm(v, g, b):
    mu = jnp.mean(v, axis=-1, keepdims=True)
    var = jnp.mean((v - mu) ** 2, axis=-1, keepdims=True)
    return (v - mu) * lax.rsqrt(var + LN_EPS) * g + b


def _bert_block_kernel(*refs, masked_first):
    if masked_first:
        x_ref, mask_ref, w_ref, out_ref = refs
    else:
        x_ref, w_ref, out_ref = refs

    def ld(name):
        rows, cols = _SLAB_SHAPE[name]
        r0 = _SLAB_OFF[name]
        return w_ref[r0:r0 + rows, 0:cols]   # static, 8-aligned slab slice

    x = x_ref[...]                           # (B*S, H)
    wqkv, bqkv = ld("wqkv"), ld("bqkv")
    wo, bo = ld("wo"), ld("bo")
    w1, b1, w2, b2 = ld("w1"), ld("b1"), ld("w2"), ld("b2")
    g1, be1, g2, be2 = ld("g1"), ld("be1"), ld("g2"), ld("be2")
    headm, segsum, sameb = ld("headm"), ld("segsum"), ld("sameb")
    mask_cols = mask_ref[...] if masked_first else None   # (1, NK)

    def attention(xin, use_mask):
        # Fused Q/K/V projection for all tokens of all batches in one matmul.
        qkv = jnp.dot(xin, wqkv, preferred_element_type=jnp.float32) + bqkv
        q, k, v = qkv[:, 0:H], qkv[:, H:2 * H], qkv[:, 2 * H:3 * H]
        # Block-diagonal K/V packing: row c = (head, batch, key) holds that
        # token's features zeroed outside its head's HS-column block, so the
        # B*NH per-head matmuls collapse into single whole-slab matmuls.
        k_bd = jnp.tile(k, (NH, 1)) * headm          # (NK, H)
        v_bd = jnp.tile(v, (NH, 1)) * headm          # (NK, H)
        # scores[t, c] = q_t . k_c over that head's features ("NT" contraction;
        # at most one hidden transpose of the whole k slab).
        s = lax.dot_general(q, k_bd, (((1,), (1,)), ((), ())),
                            preferred_element_type=jnp.float32)   # (B*S, NK)
        if use_mask:
            s = s + mask_cols                       # additive key mask, hoisted
        # Per-(head,batch) softmax over 8-column segments.  Row max is used as
        # the stability shift (softmax is shift-invariant -> exact); segment
        # denominators come from one matmul with the constant block-diagonal
        # ones matrix and are already broadcast across each segment.
        m = jnp.max(s, axis=-1, keepdims=True)
        p = jnp.exp(s - m)
        denom = jnp.dot(p, segsum, preferred_element_type=jnp.float32)
        denom = jnp.maximum(denom, jnp.float32(1e-30))   # guard fully-masked rows
        p = p * pl.reciprocal(denom, approx=True) * sameb  # zero cross-batch cols
        ctx = jnp.dot(p, v_bd, preferred_element_type=jnp.float32)     # (B*S, H)
        attn_out = jnp.dot(ctx, wo, preferred_element_type=jnp.float32) + bo
        # dropout -> identity (inference)
        return _layer_norm(xin + attn_out, g1, be1)

    if masked_first:                 # Python bool, resolved at trace time
        x = attention(x, True)
    x = attention(x, False)

    # MLP: Linear -> GELU(erf, exact like nn.GELU default) -> Linear -> res + LN
    h = jnp.dot(x, w1, preferred_element_type=jnp.float32) + b1
    h = 0.5 * h * (1.0 + lax.erf(h * (1.0 / math.sqrt(2.0))))
    mlp_out = jnp.dot(h, w2, preferred_element_type=jnp.float32) + b2
    # dropout -> identity (inference)
    out_ref[...] = _layer_norm(x + mlp_out, g2, be2)


def bert_block(x, mask, slab):
    """x: (B,S,H); mask: (B,1,S) additive mask or None; slab: packed params."""
    x2d = x.reshape(B * S, H)
    vmem = lambda: pl.BlockSpec(memory_space=pltpu.MemorySpace.VMEM)
    if mask is not None:
        # One (1, NK) row: column c = (head, batch, key) gets mask[batch, key].
        mask_cols = jnp.tile(mask.reshape(1, B * S).astype(jnp.float32), (1, NH))
        args = (x2d, mask_cols, slab)
    else:
        args = (x2d, slab)          # drop the mask DMA entirely on this path
    out2d = pl.pallas_call(
        functools.partial(_bert_block_kernel, masked_first=mask is not None),
        out_shape=jax.ShapeDtypeStruct((B * S, H), jnp.float32),
        in_specs=[vmem() for _ in range(len(args))],
        out_specs=vmem(),
    )(*args)
    return out2d.reshape(B, S, H)


def bert_block_ref(x, mask, params):
    """Pure-JAX reference mirroring the PyTorch forward."""
    (wq, bq, wk, bk, wv, bv, wo, bo, g1, be1, w1, b1, w2, b2, g2, be2) = params

    def attention(xin, m):
        q = xin @ wq.T + bq
        k = xin @ wk.T + bk
        v = xin @ wv.T + bv
        qh = q.reshape(B, S, NH, HS).transpose(0, 2, 1, 3)
        kh = k.reshape(B, S, NH, HS).transpose(0, 2, 1, 3)
        vh = v.reshape(B, S, NH, HS).transpose(0, 2, 1, 3)
        s = jnp.einsum("bnqd,bnkd->bnqk", qh, kh) / math.sqrt(HS)
        if m is not None:
            s = s + m[:, None, :, :]            # (B,1,1,S) broadcast
        p = jax.nn.softmax(s, axis=-1)
        z = jnp.einsum("bnqk,bnkd->bnqd", p, vh).transpose(0, 2, 1, 3).reshape(B, S, H)
        return _layer_norm(xin + z @ wo.T + bo, g1, be1)

    if mask is not None:
        x = attention(x, mask)
    x = attention(x, None)
    h = x @ w1.T + b1
    h = 0.5 * h * (1.0 + lax.erf(h / math.sqrt(2.0)))
    return _layer_norm(x + h @ w2.T + b2, g2, be2)


if __name__ == "__main__":
    key = jax.random.PRNGKey(0)
    keys = jax.random.split(key, 16)

    def w(k, shape, scale=0.02):
        return (scale * jax.random.normal(k, shape)).astype(jnp.float32)

    params = (
        w(keys[0], (H, H)), w(keys[1], (1, H)),                      # Q
        w(keys[2], (H, H)), w(keys[3], (1, H)),                      # K
        w(keys[4], (H, H)), w(keys[5], (1, H)),                      # V
        w(keys[6], (H, H)), w(keys[7], (1, H)),                      # O
        1.0 + w(keys[8], (1, H), 0.01), w(keys[9], (1, H), 0.01),    # LN1 gamma/beta
        w(keys[10], (I, H)), w(keys[11], (1, I)),                    # MLP in
        w(keys[12], (H, I)), w(keys[13], (1, H)),                    # MLP out
        1.0 + w(keys[14], (1, H), 0.01), w(keys[15], (1, H), 0.01),  # LN2 gamma/beta
    )

    xkey, _ = jax.random.split(key)
    x = jax.random.normal(xkey, (B, S, H), dtype=jnp.float32)
    # additive mask: keys >= 6 masked out
    mask = jnp.where(jnp.arange(S) < 6, 0.0, -10000.0).astype(jnp.float32)
    mask = jnp.broadcast_to(mask[None, None, :], (B, 1, S))

    slab = pack_bert_block_params(params)   # one-time host-side packing

    # Path with mask (attention(x, mask); attention(x); mlp(x))
    out = jax.block_until_ready(bert_block(x, mask, slab))
    ref = bert_block_ref(x, mask, params)
    assert out.shape == (B, S, H)
    # tolerance covers the approx softmax reciprocal (~1e-3 relative)
    assert jnp.allclose(out, ref, atol=2e-3, rtol=2e-3), "mismatch vs JAX reference (mask)"

    # Path without mask (module skips the masked attention entirely)
    out_nm = jax.block_until_ready(bert_block(x, None, slab))
    ref_nm = bert_block_ref(x, None, params)
    assert jnp.allclose(out_nm, ref_nm, atol=2e-3, rtol=2e-3), "mismatch vs JAX reference (no mask)"

    print("KERNEL_OK")
</pallas_src>

<mosaic_0001>
module attributes {stable_mosaic.version = 11 : i64} {
  func.func @_bert_block_kernel(%arg0: memref<16x32xf32, #tpu.memory_space<vmem>>, %arg1: memref<1x64xf32, #tpu.memory_space<vmem>>, %arg2: memref<368x128xf32, #tpu.memory_space<vmem>>, %arg3: memref<16x32xf32, #tpu.memory_space<vmem>>) attributes {dimension_semantics = [], scalar_prefetch = 0 : i64, scratch_operands = 0 : i64, tpu.core_type = #tpu.core_type<tc>} {
    %c0 = arith.constant 0 : index
    %c0_0 = arith.constant 0 : index
    %0 = vector.load %arg0[%c0, %c0_0] : memref<16x32xf32, #tpu.memory_space<vmem>>, vector<16x32xf32>
    %c0_1 = arith.constant 0 : index
    %c0_2 = arith.constant 0 : index
    %1 = vector.load %arg2[%c0_1, %c0_2] : memref<368x128xf32, #tpu.memory_space<vmem>>, vector<32x96xf32>
    %c32 = arith.constant 32 : index
    %c0_3 = arith.constant 0 : index
    %2 = vector.load %arg2[%c32, %c0_3] : memref<368x128xf32, #tpu.memory_space<vmem>>, vector<1x96xf32>
    %c40 = arith.constant 40 : index
    %c0_4 = arith.constant 0 : index
    %3 = vector.load %arg2[%c40, %c0_4] : memref<368x128xf32, #tpu.memory_space<vmem>>, vector<32x32xf32>
    %c176 = arith.constant 176 : index
    %c0_5 = arith.constant 0 : index
    %4 = vector.load %arg2[%c176, %c0_5] : memref<368x128xf32, #tpu.memory_space<vmem>>, vector<1x32xf32>
    %c72 = arith.constant 72 : index
    %c0_6 = arith.constant 0 : index
    %5 = vector.load %arg2[%c72, %c0_6] : memref<368x128xf32, #tpu.memory_space<vmem>>, vector<32x64xf32>
    %c104 = arith.constant 104 : index
    %c0_7 = arith.constant 0 : index
    %6 = vector.load %arg2[%c104, %c0_7] : memref<368x128xf32, #tpu.memory_space<vmem>>, vector<1x64xf32>
    %c112 = arith.constant 112 : index
    %c0_8 = arith.constant 0 : index
    %7 = vector.load %arg2[%c112, %c0_8] : memref<368x128xf32, #tpu.memory_space<vmem>>, vector<64x32xf32>
    %c200 = arith.constant 200 : index
    %c0_9 = arith.constant 0 : index
    %8 = vector.load %arg2[%c200, %c0_9] : memref<368x128xf32, #tpu.memory_space<vmem>>, vector<1x32xf32>
    %c184 = arith.constant 184 : index
    %c0_10 = arith.constant 0 : index
    %9 = vector.load %arg2[%c184, %c0_10] : memref<368x128xf32, #tpu.memory_space<vmem>>, vector<1x32xf32>
    %c192 = arith.constant 192 : index
    %c0_11 = arith.constant 0 : index
    %10 = vector.load %arg2[%c192, %c0_11] : memref<368x128xf32, #tpu.memory_space<vmem>>, vector<1x32xf32>
    %c208 = arith.constant 208 : index
    %c0_12 = arith.constant 0 : index
    %11 = vector.load %arg2[%c208, %c0_12] : memref<368x128xf32, #tpu.memory_space<vmem>>, vector<1x32xf32>
    %c216 = arith.constant 216 : index
    %c0_13 = arith.constant 0 : index
    %12 = vector.load %arg2[%c216, %c0_13] : memref<368x128xf32, #tpu.memory_space<vmem>>, vector<1x32xf32>
    %c224 = arith.constant 224 : index
    %c0_14 = arith.constant 0 : index
    %13 = vector.load %arg2[%c224, %c0_14] : memref<368x128xf32, #tpu.memory_space<vmem>>, vector<64x32xf32>
    %c288 = arith.constant 288 : index
    %c0_15 = arith.constant 0 : index
    %14 = vector.load %arg2[%c288, %c0_15] : memref<368x128xf32, #tpu.memory_space<vmem>>, vector<64x64xf32>
    %c352 = arith.constant 352 : index
    %c0_16 = arith.constant 0 : index
    %15 = vector.load %arg2[%c352, %c0_16] : memref<368x128xf32, #tpu.memory_space<vmem>>, vector<16x64xf32>
    %c0_17 = arith.constant 0 : index
    %c0_18 = arith.constant 0 : index
    %16 = vector.load %arg1[%c0_17, %c0_18] : memref<1x64xf32, #tpu.memory_space<vmem>>, vector<1x64xf32>
    %cst = arith.constant dense<0.000000e+00> : vector<16x96xf32>
    %17 = tpu.matmul %0, %1, %cst {dimension_numbers = #tpu.dot_dimension_numbers<[1], [0], [0], [1], [0, 0, 1, 1], [], []>} : vector<16x32xf32>, vector<32x96xf32>, vector<16x96xf32> -> vector<16x96xf32>
    %18 = vector.broadcast %2 : vector<1x96xf32> to vector<16x96xf32>
    %19 = arith.addf %17, %18 : vector<16x96xf32>
    %20 = vector.extract_strided_slice %19 {offsets = [0, 0], sizes = [16, 32], strides = [1, 1]} : vector<16x96xf32> to vector<16x32xf32>
    %21 = vector.extract_strided_slice %19 {offsets = [0, 32], sizes = [16, 32], strides = [1, 1]} : vector<16x96xf32> to vector<16x32xf32>
    %22 = vector.extract_strided_slice %19 {offsets = [0, 64], sizes = [16, 32], strides = [1, 1]} : vector<16x96xf32> to vector<16x32xf32>
    %23 = tpu.concatenate %21, %21, %21, %21 in 0 : vector<16x32xf32>, vector<16x32xf32>, vector<16x32xf32>, vector<16x32xf32> -> vector<64x32xf32>
    %24 = arith.mulf %23, %13 : vector<64x32xf32>
    %25 = tpu.concatenate %22, %22, %22, %22 in 0 : vector<16x32xf32>, vector<16x32xf32>, vector<16x32xf32>, vector<16x32xf32> -> vector<64x32xf32>
    %26 = arith.mulf %25, %13 : vector<64x32xf32>
    %cst_19 = arith.constant dense<0.000000e+00> : vector<16x64xf32>
    %27 = tpu.matmul %20, %24, %cst_19 {dimension_numbers = #tpu.dot_dimension_numbers<[1], [1], [0], [0], [0, 0, 1, 0], [], []>} : vector<16x32xf32>, vector<64x32xf32>, vector<16x64xf32> -> vector<16x64xf32>
    %28 = vector.broadcast %16 : vector<1x64xf32> to vector<16x64xf32>
    %29 = arith.addf %27, %28 : vector<16x64xf32>
    %cst_20 = arith.constant dense<0xFF800000> : vector<16xf32>
    %30 = vector.multi_reduction <maximumf>, %29, %cst_20 [1] : vector<16x64xf32> to vector<16xf32>
    %31 = vector.shape_cast %30 : vector<16xf32> to vector<16x1xf32>
    %32 = vector.broadcast %31 : vector<16x1xf32> to vector<16x64xf32>
    %33 = arith.subf %29, %32 : vector<16x64xf32>
    %34 = math.exp %33 : vector<16x64xf32>
    %cst_21 = arith.constant dense<0.000000e+00> : vector<16x64xf32>
    %35 = tpu.matmul %34, %14, %cst_21 {dimension_numbers = #tpu.dot_dimension_numbers<[1], [0], [0], [1], [0, 0, 1, 1], [], []>} : vector<16x64xf32>, vector<64x64xf32>, vector<16x64xf32> -> vector<16x64xf32>
    %cst_22 = arith.constant 1.000000e-30 : f32
    %36 = vector.broadcast %cst_22 : f32 to vector<16x64xf32>
    %37 = arith.maximumf %35, %36 : vector<16x64xf32>
    %38 = tpu.reciprocal %37 {approx = true} : vector<16x64xf32> -> vector<16x64xf32>
    %39 = arith.mulf %34, %38 : vector<16x64xf32>
    %40 = arith.mulf %39, %15 : vector<16x64xf32>
    %cst_23 = arith.constant dense<0.000000e+00> : vector<16x32xf32>
    %41 = tpu.matmul %40, %26, %cst_23 {dimension_numbers = #tpu.dot_dimension_numbers<[1], [0], [0], [1], [0, 0, 1, 1], [], []>} : vector<16x64xf32>, vector<64x32xf32>, vector<16x32xf32> -> vector<16x32xf32>
    %cst_24 = arith.constant dense<0.000000e+00> : vector<16x32xf32>
    %42 = tpu.matmul %41, %3, %cst_24 {dimension_numbers = #tpu.dot_dimension_numbers<[1], [0], [0], [1], [0, 0, 1, 1], [], []>} : vector<16x32xf32>, vector<32x32xf32>, vector<16x32xf32> -> vector<16x32xf32>
    %43 = vector.broadcast %4 : vector<1x32xf32> to vector<16x32xf32>
    %44 = arith.addf %42, %43 : vector<16x32xf32>
    %45 = arith.addf %0, %44 : vector<16x32xf32>
    %cst_25 = arith.constant dense<0.000000e+00> : vector<16xf32>
    %46 = vector.multi_reduction <add>, %45, %cst_25 [1] : vector<16x32xf32> to vector<16xf32>
    %47 = vector.shape_cast %46 : vector<16xf32> to vector<16x1xf32>
    %cst_26 = arith.constant 3.200000e+01 : f32
    %48 = vector.broadcast %cst_26 : f32 to vector<16x1xf32>
    %49 = arith.divf %47, %48 : vector<16x1xf32>
    %50 = vector.broadcast %49 : vector<16x1xf32> to vector<16x32xf32>
    %51 = arith.subf %45, %50 : vector<16x32xf32>
    %52 = arith.mulf %51, %51 : vector<16x32xf32>
    %cst_27 = arith.constant dense<0.000000e+00> : vector<16xf32>
    %53 = vector.multi_reduction <add>, %52, %cst_27 [1] : vector<16x32xf32> to vector<16xf32>
    %54 = vector.shape_cast %53 : vector<16xf32> to vector<16x1xf32>
    %cst_28 = arith.constant 3.200000e+01 : f32
    %55 = vector.broadcast %cst_28 : f32 to vector<16x1xf32>
    %56 = arith.divf %54, %55 : vector<16x1xf32>
    %57 = vector.broadcast %49 : vector<16x1xf32> to vector<16x32xf32>
    %58 = arith.subf %45, %57 : vector<16x32xf32>
    %cst_29 = arith.constant 9.99999996E-13 : f32
    %59 = vector.broadcast %cst_29 : f32 to vector<16x1xf32>
    %60 = arith.addf %56, %59 : vector<16x1xf32>
    %61 = math.rsqrt %60 : vector<16x1xf32>
    %62 = vector.broadcast %61 : vector<16x1xf32> to vector<16x32xf32>
    %63 = arith.mulf %58, %62 : vector<16x32xf32>
    %64 = vector.broadcast %9 : vector<1x32xf32> to vector<16x32xf32>
    %65 = arith.mulf %63, %64 : vector<16x32xf32>
    %66 = vector.broadcast %10 : vector<1x32xf32> to vector<16x32xf32>
    %67 = arith.addf %65, %66 : vector<16x32xf32>
    %cst_30 = arith.constant dense<0.000000e+00> : vector<16x96xf32>
    %68 = tpu.matmul %67, %1, %cst_30 {dimension_numbers = #tpu.dot_dimension_numbers<[1], [0], [0], [1], [0, 0, 1, 1], [], []>} : vector<16x32xf32>, vector<32x96xf32>, vector<16x96xf32> -> vector<16x96xf32>
    %69 = vector.broadcast %2 : vector<1x96xf32> to vector<16x96xf32>
    %70 = arith.addf %68, %69 : vector<16x96xf32>
    %71 = vector.extract_strided_slice %70 {offsets = [0, 0], sizes = [16, 32], strides = [1, 1]} : vector<16x96xf32> to vector<16x32xf32>
    %72 = vector.extract_strided_slice %70 {offsets = [0, 32], sizes = [16, 32], strides = [1, 1]} : vector<16x96xf32> to vector<16x32xf32>
    %73 = vector.extract_strided_slice %70 {offsets = [0, 64], sizes = [16, 32], strides = [1, 1]} : vector<16x96xf32> to vector<16x32xf32>
    %74 = tpu.concatenate %72, %72, %72, %72 in 0 : vector<16x32xf32>, vector<16x32xf32>, vector<16x32xf32>, vector<16x32xf32> -> vector<64x32xf32>
    %75 = arith.mulf %74, %13 : vector<64x32xf32>
    %76 = tpu.concatenate %73, %73, %73, %73 in 0 : vector<16x32xf32>, vector<16x32xf32>, vector<16x32xf32>, vector<16x32xf32> -> vector<64x32xf32>
    %77 = arith.mulf %76, %13 : vector<64x32xf32>
    %cst_31 = arith.constant dense<0.000000e+00> : vector<16x64xf32>
    %78 = tpu.matmul %71, %75, %cst_31 {dimension_numbers = #tpu.dot_dimension_numbers<[1], [1], [0], [0], [0, 0, 1, 0], [], []>} : vector<16x32xf32>, vector<64x32xf32>, vector<16x64xf32> -> vector<16x64xf32>
    %cst_32 = arith.constant dense<0xFF800000> : vector<16xf32>
    %79 = vector.multi_reduction <maximumf>, %78, %cst_32 [1] : vector<16x64xf32> to vector<16xf32>
    %80 = vector.shape_cast %79 : vector<16xf32> to vector<16x1xf32>
    %81 = vector.broadcast %80 : vector<16x1xf32> to vector<16x64xf32>
    %82 = arith.subf %78, %81 : vector<16x64xf32>
    %83 = math.exp %82 : vector<16x64xf32>
    %cst_33 = arith.constant dense<0.000000e+00> : vector<16x64xf32>
    %84 = tpu.matmul %83, %14, %cst_33 {dimension_numbers = #tpu.dot_dimension_numbers<[1], [0], [0], [1], [0, 0, 1, 1], [], []>} : vector<16x64xf32>, vector<64x64xf32>, vector<16x64xf32> -> vector<16x64xf32>
    %cst_34 = arith.constant 1.000000e-30 : f32
    %85 = vector.broadcast %cst_34 : f32 to vector<16x64xf32>
    %86 = arith.maximumf %84, %85 : vector<16x64xf32>
    %87 = tpu.reciprocal %86 {approx = true} : vector<16x64xf32> -> vector<16x64xf32>
    %88 = arith.mulf %83, %87 : vector<16x64xf32>
    %89 = arith.mulf %88, %15 : vector<16x64xf32>
    %cst_35 = arith.constant dense<0.000000e+00> : vector<16x32xf32>
    %90 = tpu.matmul %89, %77, %cst_35 {dimension_numbers = #tpu.dot_dimension_numbers<[1], [0], [0], [1], [0, 0, 1, 1], [], []>} : vector<16x64xf32>, vector<64x32xf32>, vector<16x32xf32> -> vector<16x32xf32>
    %cst_36 = arith.constant dense<0.000000e+00> : vector<16x32xf32>
    %91 = tpu.matmul %90, %3, %cst_36 {dimension_numbers = #tpu.dot_dimension_numbers<[1], [0], [0], [1], [0, 0, 1, 1], [], []>} : vector<16x32xf32>, vector<32x32xf32>, vector<16x32xf32> -> vector<16x32xf32>
    %92 = vector.broadcast %4 : vector<1x32xf32> to vector<16x32xf32>
    %93 = arith.addf %91, %92 : vector<16x32xf32>
    %94 = arith.addf %67, %93 : vector<16x32xf32>
    %cst_37 = arith.constant dense<0.000000e+00> : vector<16xf32>
    %95 = vector.multi_reduction <add>, %94, %cst_37 [1] : vector<16x32xf32> to vector<16xf32>
    %96 = vector.shape_cast %95 : vector<16xf32> to vector<16x1xf32>
    %cst_38 = arith.constant 3.200000e+01 : f32
    %97 = vector.broadcast %cst_38 : f32 to vector<16x1xf32>
    %98 = arith.divf %96, %97 : vector<16x1xf32>
    %99 = vector.broadcast %98 : vector<16x1xf32> to vector<16x32xf32>
    %100 = arith.subf %94, %99 : vector<16x32xf32>
    %101 = arith.mulf %100, %100 : vector<16x32xf32>
    %cst_39 = arith.constant dense<0.000000e+00> : vector<16xf32>
    %102 = vector.multi_reduction <add>, %101, %cst_39 [1] : vector<16x32xf32> to vector<16xf32>
    %103 = vector.shape_cast %102 : vector<16xf32> to vector<16x1xf32>
    %cst_40 = arith.constant 3.200000e+01 : f32
    %104 = vector.broadcast %cst_40 : f32 to vector<16x1xf32>
    %105 = arith.divf %103, %104 : vector<16x1xf32>
    %106 = vector.broadcast %98 : vector<16x1xf32> to vector<16x32xf32>
    %107 = arith.subf %94, %106 : vector<16x32xf32>
    %cst_41 = arith.constant 9.99999996E-13 : f32
    %108 = vector.broadcast %cst_41 : f32 to vector<16x1xf32>
    %109 = arith.addf %105, %108 : vector<16x1xf32>
    %110 = math.rsqrt %109 : vector<16x1xf32>
    %111 = vector.broadcast %110 : vector<16x1xf32> to vector<16x32xf32>
    %112 = arith.mulf %107, %111 : vector<16x32xf32>
    %113 = vector.broadcast %9 : vector<1x32xf32> to vector<16x32xf32>
    %114 = arith.mulf %112, %113 : vector<16x32xf32>
    %115 = vector.broadcast %10 : vector<1x32xf32> to vector<16x32xf32>
    %116 = arith.addf %114, %115 : vector<16x32xf32>
    %cst_42 = arith.constant dense<0.000000e+00> : vector<16x64xf32>
    %117 = tpu.matmul %116, %5, %cst_42 {dimension_numbers = #tpu.dot_dimension_numbers<[1], [0], [0], [1], [0, 0, 1, 1], [], []>} : vector<16x32xf32>, vector<32x64xf32>, vector<16x64xf32> -> vector<16x64xf32>
    %118 = vector.broadcast %6 : vector<1x64xf32> to vector<16x64xf32>
    %119 = arith.addf %117, %118 : vector<16x64xf32>
    %cst_43 = arith.constant 5.000000e-01 : f32
    %120 = vector.broadcast %cst_43 : f32 to vector<16x64xf32>
    %121 = arith.mulf %120, %119 : vector<16x64xf32>
    %cst_44 = arith.constant 0.707106769 : f32
    %122 = vector.broadcast %cst_44 : f32 to vector<16x64xf32>
    %123 = arith.mulf %119, %122 : vector<16x64xf32>
    %124 = math.erf %123 : vector<16x64xf32>
    %cst_45 = arith.constant 1.000000e+00 : f32
    %125 = vector.broadcast %cst_45 : f32 to vector<16x64xf32>
    %126 = arith.addf %125, %124 : vector<16x64xf32>
    %127 = arith.mulf %121, %126 : vector<16x64xf32>
    %cst_46 = arith.constant dense<0.000000e+00> : vector<16x32xf32>
    %128 = tpu.matmul %127, %7, %cst_46 {dimension_numbers = #tpu.dot_dimension_numbers<[1], [0], [0], [1], [0, 0, 1, 1], [], []>} : vector<16x64xf32>, vector<64x32xf32>, vector<16x32xf32> -> vector<16x32xf32>
    %129 = vector.broadcast %8 : vector<1x32xf32> to vector<16x32xf32>
    %130 = arith.addf %128, %129 : vector<16x32xf32>
    %131 = arith.addf %116, %130 : vector<16x32xf32>
    %cst_47 = arith.constant dense<0.000000e+00> : vector<16xf32>
    %132 = vector.multi_reduction <add>, %131, %cst_47 [1] : vector<16x32xf32> to vector<16xf32>
    %133 = vector.shape_cast %132 : vector<16xf32> to vector<16x1xf32>
    %cst_48 = arith.constant 3.200000e+01 : f32
    %134 = vector.broadcast %cst_48 : f32 to vector<16x1xf32>
    %135 = arith.divf %133, %134 : vector<16x1xf32>
    %136 = vector.broadcast %135 : vector<16x1xf32> to vector<16x32xf32>
    %137 = arith.subf %131, %136 : vector<16x32xf32>
    %138 = arith.mulf %137, %137 : vector<16x32xf32>
    %cst_49 = arith.constant dense<0.000000e+00> : vector<16xf32>
    %139 = vector.multi_reduction <add>, %138, %cst_49 [1] : vector<16x32xf32> to vector<16xf32>
    %140 = vector.shape_cast %139 : vector<16xf32> to vector<16x1xf32>
    %cst_50 = arith.constant 3.200000e+01 : f32
    %141 = vector.broadcast %cst_50 : f32 to vector<16x1xf32>
    %142 = arith.divf %140, %141 : vector<16x1xf32>
    %143 = vector.broadcast %135 : vector<16x1xf32> to vector<16x32xf32>
    %144 = arith.subf %131, %143 : vector<16x32xf32>
    %cst_51 = arith.constant 9.99999996E-13 : f32
    %145 = vector.broadcast %cst_51 : f32 to vector<16x1xf32>
    %146 = arith.addf %142, %145 : vector<16x1xf32>
    %147 = math.rsqrt %146 : vector<16x1xf32>
    %148 = vector.broadcast %147 : vector<16x1xf32> to vector<16x32xf32>
    %149 = arith.mulf %144, %148 : vector<16x32xf32>
    %150 = vector.broadcast %11 : vector<1x32xf32> to vector<16x32xf32>
    %151 = arith.mulf %149, %150 : vector<16x32xf32>
    %152 = vector.broadcast %12 : vector<1x32xf32> to vector<16x32xf32>
    %153 = arith.addf %151, %152 : vector<16x32xf32>
    %c0_52 = arith.constant 0 : index
    %c0_53 = arith.constant 0 : index
    %154 = vector.load %arg3[%c0_52, %c0_53] : memref<16x32xf32, #tpu.memory_space<vmem>>, vector<16x32xf32>
    tpu.vector_store %arg3[%c0_52, %c0_53], %153 {strides = array<i32>} : memref<16x32xf32, #tpu.memory_space<vmem>>, vector<16x32xf32>,
    return
  }
}

</mosaic_0001>

<bundles_post_ra>
// kernel: tpu_custom_call.1
= control target key start
LH: loop header
LB: loop body
LE: loop exit
PB: predicated region body
PF: predicated region fallthrough
CT: control target
= control target key end

     0   :  { %8 = vsyncpa [#allocation3], 0  ;;  %s2616_s0 = inlined_call_operand.hbm [shape: f32[16,32], index: 0, kind: input, shape index: {}]   ;;  %s2617_s1 = inlined_call_operand.vmem [shape: f32[1,64], index: 1, kind: input, shape index: {}]   ;;  %s2618_s2 = inlined_call_operand.hbm [shape: f32[368,128], index: 2, kind: input, shape index: {}]   ;;  %s2619_s3 = inlined_call_operand.hbm [shape: f32[16,32], index: 3, kind: output, shape index: {}]  }
   0x1   :  { %9 = vsyncpa [#allocation6], 0 }
   0x2   :  { %10 = vsyncpa [#allocation4], 0  ;;  %s2200_s12 = smov [#allocation2]   ;;  %s2128_s16 = scalar_lea.hbm %s2616_s0, 256 }
   0x3   :  { %s16_s13 = sshll.u32 %s2200_s12, 4  ;;  %p2129_p0 = scmp.ne.s32.totalorder %s2616_s0, %s2128_s16  ;;  %s17_s13 = int_to_ptr.vmem [resolvable:$true] %s16_s13 }
   0x4   :  { %p2132_p1 = scmp.lt.u32.totalorder %s2128_s16, %s2616_s0 }
   0x6   :  { %p2134_p2 = pnand %p2132_p1, %p2129_p0 }
   0x8   :  { %2137 = shalt.err (!%p2134_p2)
}
   0x9   :  { %s2138_s21 = scalar_lea.vmem %s17_s13, 256  ;;  %p2143_p4 = scmp.lt.s32.totalorder %s17_s13, %s17_s13 }
   0xa   :  { %p2139_p3 = scmp.ne.s32.totalorder %s17_s13, %s2138_s21  ;;  %p2144_p5 = scmp.lt.s32.totalorder %s2138_s21, %s2138_s21 }
   0xc   :  { %p2145_p6 = por %p2144_p5, %p2143_p4 }
   0xe   :  { %p2146_p7 = pnand %p2145_p6, %p2139_p3 }
  0x10   :  { %2149 = shalt.err (!%p2146_p7)
}
  0x11   :  { %s2201_s22 = smov 128   ;;  %s2202_s23 = smov 8  }
  0x12   :  { %22 = dma.hbm_to_vmem [thread:$0]  %s2616_s0, 256, %s17_s13, [#allocation3], %s2201_s22, %s2201_s22, %s2202_s23  }
  0x13   :  { %s2203_s26 = smov [#allocation5]   ;;  %s2150_s30 = scalar_lea.hbm %s2618_s2, 5888 }
  0x14   :  { %s30_s27 = sshll.u32 %s2203_s26, 4  ;;  %p2151_p8 = scmp.ne.s32.totalorder %s2618_s2, %s2150_s30  ;;  %s31_s27 = int_to_ptr.vmem [resolvable:$true] %s30_s27 }
  0x15   :  { %p2154_p9 = scmp.lt.u32.totalorder %s2150_s30, %s2618_s2 }
  0x17   :  { %p2156_p10 = pnand %p2154_p9, %p2151_p8 }
  0x19   :  { %2159 = shalt.err (!%p2156_p10)
}
  0x1a   :  { %s2160_s8 = scalar_lea.vmem %s31_s27, 5888  ;;  %p2165_p12 = scmp.lt.s32.totalorder %s31_s27, %s31_s27 }
  0x1b   :  { %p2161_p11 = scmp.ne.s32.totalorder %s31_s27, %s2160_s8  ;;  %p2166_p13 = scmp.lt.s32.totalorder %s2160_s8, %s2160_s8 }
  0x1d   :  { %p2167_p0 = por %p2166_p13, %p2165_p12 }
  0x1f   :  { %p2168_p1 = pnand %p2167_p0, %p2161_p11 }
  0x21   :  { %2171 = shalt.err (!%p2168_p1)
}
  0x22   :  { %36 = dma.hbm_to_vmem [thread:$0]  %s2618_s2, 5888, %s31_s27, [#allocation6], %s2201_s22, %s2201_s22, %s2202_s23  }
  0x23   :  { %2194 = dma.done.wait [#allocation3], 256  }
  0x24   :  { %2195 = vsyncadd [#allocation3], 4294967040 }
  0x25   :  { %2196 = dma.done.wait [#allocation6], 5888  }
  0x26   :  { %2197 = vsyncadd [#allocation6], 4294961408  ;;  %vm96_vm0 = vcmask 261120   ;;  %v45_v0 = vld [vmem:[#allocation5] sm:$0xff]  ;;  %v46_v1 = vld [vmem:[#allocation5 + $0x8] sm:$0xff]  ;;  %s2204_s2 = smov 32  }
  0x27   :  { %v47_v2 = vld [vmem:[#allocation5 + $0x10] sm:$0xff]  ;;  %v2258_v3 = vpack.c.bf16 %v46_v1, %v45_v0  ;;  %v48_v4 = vld [vmem:[#allocation5 + $0x18] sm:$0xff]  ;;  %v2268_v8 = vld [vmem:[#allocation5 + $0xe0] sm:$0xff]  ;;  %s2205_s10 = smov 96   ;;  %vm377_vm2 = vcmask 523264   ;;  %s2207_s13 = smov [#allocation7]  }
  0x28   :  { %v2260_v5 = vld [vmem:[#allocation2] sm:$0xff]  ;;  %v2262_v6 = vpack.c.bf16 %v48_v4, %v47_v2  ;;  %186 = vrot.lane.b32.xlu0 %v2268_v8, %s2204_s2  ;;  %v2274_v9 = vld [vmem:[#allocation5 + $0xf8] sm:$0xff]  ;;  %v2277_v10 = vld [vmem:[#allocation5 + $0xe8] sm:$0xff]  ;;  %s1490_s14 = sshll.u32 %s2207_s13, 4  ;;  %s1491_s14 = int_to_ptr.vmem [resolvable:$true] %s1490_s14 }
  0x29   :  { %1660 = vmatprep.mubr.msk.f32.mxu0 %vm96_vm0, %v2260_v5  ;;  %v2266_v7 = vld [vmem:[#allocation5 + $0xf0] sm:$0xff]  ;;  %1841 = vmatprep.subr.bf16.mxu0 %v2258_v3  ;;  %v2281_v11 = vld [vmem:[#allocation2 + $0x8] sm:$0xff]  ;;  %v2284_v12 = vld [vmem:[#allocation5 + $0x108] sm:$0xff]  ;;  %s2172_s15 = scalar_lea.vmem %s1491_s14, 256  ;;  %p2177_p3 = scmp.lt.s32.totalorder %s1491_s14, %s1491_s14 }
  0x2a   :  { %190 = vrot.lane.b32.xlu1 %v2266_v7, %s2204_s2  ;;  %1843 = vmatpush3.bf16.msra.mxu0 %v2258_v3  ;;  %v2286_v13 = vld [vmem:[#allocation5 + $0x100] sm:$0xff]  ;;  %v2292_v14 = vld [vmem:[#allocation5 + $0x118] sm:$0xff]  ;;  %v2294_v15 = vld [vmem:[#allocation5 + $0x110] sm:$0xff]  ;;  %p2173_p2 = scmp.ne.s32.totalorder %s1491_s14, %s2172_s15  ;;  %p2178_p4 = scmp.lt.s32.totalorder %s2172_s15, %s2172_s15 }
  0x2b   :  { %1845 = vmatprep.subr.bf16.mxu0 %v2262_v6  ;;  %v2310_v22 = vld [vmem:[#allocation5 + $0x20] ss:$0 sm:$0xff]  ;;  %vm2346_vm1 = vmpackc.low %vm96_vm0, %vm96_vm0  ;;  %v1506_v58 = vld [vmem:[%s2617_s1] ss:$0 sm:$0xff]  ;;  %s2206_s1 = smov 64  }
  0x2c   :  { %188 = vrot.lane.b32.xlu0 %v2277_v10, %s2204_s2  ;;  %v81_v1 = vld [vmem:[#allocation5 + $0x120] sm:$0xff]  ;;  %v82_v2 = vld [vmem:[#allocation5 + $0x128] sm:$0xff]  ;;  %p2179_p5 = por %p2178_p4, %p2177_p3 }
  0x2d   :  { %v2373_v4 = vpack.c.bf16 %v82_v2, %v81_v1 }
  0x2e   :  { %192 = vrot.lane.b32.xlu1 %v2274_v9, %s2204_s2  ;;  %1847 = vmatpush3.bf16.msra.mxu0 %v2262_v6  ;;  %p2180_p6 = pnand %p2179_p5, %p2173_p2 }
  0x2f   :  { %1873 = vmatprep.subr.bf16.mxu0 %v2373_v4 }
  0x30   :  { %194 = vrot.lane.b32.xlu0 %v2286_v13, %s2204_s2 }
  0x31   :  { %1661 = vmatmul.mubr.msk.f32.vlgmr.msra.gmra.mrb[0].mxu0 %vm96_vm0, %v2281_v11 }
  0x32   :  { %196 = vrot.lane.b32.xlu1 %v2284_v12, %s2204_s2  ;;  %1875 = vmatpush3.bf16.msra.mxu0 %v2373_v4 }
  0x34   :  { %198 = vrot.lane.b32.xlu0 %v2294_v15, %s2204_s2 }
  0x36   :  { %200 = vrot.lane.b32.xlu1 %v2292_v14, %s2204_s2 }
  0x9a   :  { %v2300_v17 = vpop.permute.xlu0 %186 }
  0x9c   :  { %v2298_v16 = vpop.permute.xlu1 %190 }
  0x9e   :  { %v2304_v19 = vpop.permute.xlu0 %188 }
  0xa0   :  { %v2302_v18 = vpop.permute.xlu1 %192 }
  0xa2   :  { %v2308_v21 = vpop.permute.xlu0 %194 }
  0xa4   :  { %v2306_v20 = vpop.permute.xlu1 %196 }
  0xa6   :  { %v2320_v28 = vpop.permute.xlu0 %198 }
  0xa8   :  { %v2318_v27 = vpop.permute.xlu1 %200 }
 0x104   :  { %v1662_v23 = vpop.f32.mrb[0].mxu0 }
 0x105   :  { %v2313_v24 = vadd.f32 %v1662_v23, %v2310_v22  ;;  %v169_v25 = vpop.f32.mrb[1].mxu0  ;;  %v83_v23 = vld [vmem:[#allocation5 + $0x130] sm:$0xff] }
 0x106   :  { %v2316_v26 = vadd.f32 %v2310_v22, %v169_v25  ;;  %v84_v25 = vld [vmem:[#allocation5 + $0x138] sm:$0xff] }
 0x107   :  { %v213_v29 = vmul.f32 %v2302_v18, %v2313_v24  ;;  %v211_v30 = vmul.f32 %v2304_v19, %v2313_v24  ;;  %v217_v33 = vmul.f32 %v2318_v27, %v2313_v24  ;;  %v215_v34 = vmul.f32 %v2306_v20, %v2313_v24 }
 0x108   :  { %1679 = vmatprep.mubr.msk.f32.mxu1 %vm96_vm0, %v2316_v26  ;;  %v212_v31 = vmul.f32 %v2298_v16, %v2316_v26  ;;  %v210_v32 = vmul.f32 %v2300_v17, %v2316_v26  ;;  %v216_v35 = vmul.f32 %v2320_v28, %v2316_v26  ;;  %v214_v38 = vmul.f32 %v2308_v21, %v2316_v26 }
 0x10a   :  { %v2021_v36 = vpack.i.bf16 %v213_v29, %v212_v31  ;;  %v2016_v37 = vpack.i.bf16 %v211_v30, %v210_v32  ;;  %v2031_v39 = vpack.i.bf16 %v217_v33, %v216_v35  ;;  %v2026_v40 = vpack.i.bf16 %v215_v34, %v214_v38  ;;  %v85_v30 = vld [vmem:[#allocation5 + $0x140] sm:$0xff]  ;;  %v86_v31 = vld [vmem:[#allocation5 + $0x148] sm:$0xff]  ;;  %v88_v33 = vld [vmem:[#allocation5 + $0x158] sm:$0xff] }
 0x10b   :  { %v2379_v29 = vpack.c.bf16 %v84_v25, %v83_v23  ;;  %v2385_v32 = vpack.c.bf16 %v86_v31, %v85_v30 }
 0x10c   :  { %2022 = vrot.lane.b32.xlu1 %v2021_v36, %s2205_s10  ;;  %2017 = vrot.lane.b32.xlu0 %v2016_v37, %s2205_s10 }
 0x10d   :  { %1877 = vmatprep.subr.bf16.mxu0 %v2379_v29 }
 0x10e   :  { %1879 = vmatpush3.bf16.msra.mxu0 %v2379_v29 }
 0x10f   :  { %1881 = vmatprep.subr.bf16.mxu0 %v2385_v32 }
 0x110   :  { %2032 = vrot.lane.b32.xlu1 %v2031_v39, %s2205_s10  ;;  %2027 = vrot.lane.b32.xlu0 %v2026_v40, %s2205_s10 }
 0x112   :  { %1883 = vmatpush3.bf16.msra.mxu0 %v2385_v32 }
 0x17e   :  { %v2023_v41 = vpop.permute.xlu1 %2022  ;;  %v2018_v42 = vpop.permute.xlu0 %2017 }
 0x17f   :  { %v2025_v43 = vunpack.i.h.bf16 %v2023_v41  ;;  %v2024_v44 = vunpack.i.l.bf16 %v2023_v41  ;;  %v2020_v45 = vunpack.i.h.bf16 %v2018_v42  ;;  %v2019_v46 = vunpack.i.l.bf16 %v2018_v42 }
 0x181   :  { %v1848_v48 = vpack.c.bf16 %v2020_v45, %v2019_v46  ;;  %v1854_v49 = vpack.c.bf16 %v2025_v43, %v2024_v44 }
 0x182   :  { %v2028_v50 = vpop.permute.xlu0 %2027  ;;  %v2033_v54 = vpop.permute.xlu1 %2032 }
 0x183   :  { %1850 = vmatprep.subr.msk.bf16.mxu1 %vm2346_vm1, %v1848_v48  ;;  %v2030_v51 = vunpack.i.h.bf16 %v2028_v50  ;;  %v2029_v52 = vunpack.i.l.bf16 %v2028_v50  ;;  %v2035_v55 = vunpack.i.h.bf16 %v2033_v54  ;;  %v2034_v56 = vunpack.i.l.bf16 %v2033_v54 }
 0x184   :  { %1853 = vmatpush3.bf16.xpose.msk.msra.mxu1 %vm2346_vm1, %v1848_v48 }
 0x185   :  { %1856 = vmatprep.subr.msk.bf16.mxu1 %vm2346_vm1, %v1854_v49  ;;  %v1860_v53 = vpack.c.bf16 %v2030_v51, %v2029_v52  ;;  %v1866_v57 = vpack.c.bf16 %v2035_v55, %v2034_v56 }
 0x18c   :  { %1859 = vmatpush3.bf16.xpose.msk.msra.mxu1 %vm2346_vm1, %v1854_v49 }
 0x18d   :  { %1862 = vmatprep.subr.msk.bf16.mxu1 %vm2346_vm1, %v1860_v53 }
 0x194   :  { %1865 = vmatpush3.bf16.xpose.msk.msra.mxu1 %vm2346_vm1, %v1860_v53 }
 0x195   :  { %1868 = vmatprep.subr.msk.bf16.mxu1 %vm2346_vm1, %v1866_v57 }
 0x19c   :  { %1871 = vmatpush3.bf16.xpose.msk.msra.mxu1 %vm2346_vm1, %v1866_v57  ;;  %v50_v57 = vld [vmem:[#allocation5 + $0x28] sm:$0xff] }
 0x1a3   :  { %1680 = vmatmul.mubr.msk.f32.vlgmr.msra.gmra.mrb[0].mxu1 %vm96_vm0, %v2313_v24 }
 0x276   :  { %v1681_v59 = vpop.f32.mrb[0].mxu1 }
 0x277   :  { %v374_v60 = vadd.f32 %v1681_v59, %v1506_v58  ;;  %v368_v61 = vpop.f32.mrb[1].mxu1  ;;  %v52_v59 = vld [vmem:[#allocation5 + $0x38] sm:$0xff] }
 0x278   :  { %v369_v62 = vadd.f32 %v1506_v58, %v368_v61  ;;  %v51_v58 = vld [vmem:[#allocation5 + $0x30] sm:$0xff] }
 0x279   :  { %v381_v63 = vsel %vm377_vm2, %v374_v60, -inf }
 0x27a   :  { %382 = vmax.xlane.f32.xlu1 %v381_v63  ;;  %v378_v0 = vsel %vm377_vm2, %v369_v62, -inf }
 0x27b   :  { %379 = vmax.xlane.f32.xlu0 %v378_v0 }
 0x28b   :  { %220 = vrot.lane.b32.xlu1 %v2277_v10, %s2206_s1  ;;  %v87_v10 = vld [vmem:[#allocation5 + $0x150] sm:$0xff] }
 0x28c   :  { %v2393_v34 = vpack.c.bf16 %v88_v33, %v87_v10 }
 0x28e   :  { %1885 = vmatprep.subr.bf16.mxu0 %v2393_v34 }
 0x28f   :  { %224 = vrot.lane.b32.xlu1 %v2274_v9, %s2206_s1  ;;  %1887 = vmatpush3.bf16.msra.mxu0 %v2393_v34 }
 0x291   :  { %218 = vrot.lane.b32.xlu0 %v2268_v8, %s2206_s1 }
 0x293   :  { %228 = vrot.lane.b32.xlu1 %v2284_v12, %s2206_s1 }
 0x295   :  { %222 = vrot.lane.b32.xlu0 %v2266_v7, %s2206_s1 }
 0x297   :  { %232 = vrot.lane.b32.xlu1 %v2292_v14, %s2206_s1 }
 0x299   :  { %226 = vrot.lane.b32.xlu0 %v2286_v13, %s2206_s1 }
 0x29d   :  { %230 = vrot.lane.b32.xlu0 %v2294_v15, %s2206_s1 }
 0x307   :  { %v383_v8 = vpop.xlane.xlu1 %382 }
 0x308   :  { %v385_v9 = vsub.f32 %v374_v60, %v383_v8  ;;  %v380_v12 = vpop.xlane.xlu0 %379  ;;  %v2443_v60 = vpack.c.bf16 %v51_v58, %v50_v57 }
 0x309   :  { %v384_v35 = vsub.f32 %v369_v62, %v380_v12 }
 0x30a   :  { %v388_v36 = vmul.f32 1.442695, %v385_v9  ;;  %1905 = vmatprep.subr.bf16.mxu1 %v2443_v60 }
 0x30b   :  { %v386_v37 = vmul.f32 1.442695, %v384_v35  ;;  %v2405_v7 = vpop.permute.xlu1 %220  ;;  %1907 = vmatpush3.bf16.msra.mxu1 %v2443_v60 }
 0x30c   :  { %v243_v38 = vmul.f32 %v2405_v7, %v2313_v24  ;;  %v2409_v39 = vpop.permute.xlu0 %218 }
 0x30d   :  { %2096 = vpow2.f32 %v386_v37  ;;  %v242_v13 = vmul.f32 %v2409_v39, %v2316_v26 }
 0x30e   :  { %2098 = vpow2.f32 %v388_v36 }
 0x30f   :  { %v2036_v14 = vpack.i.bf16 %v243_v38, %v242_v13  ;;  %v2413_v15 = vpop.permute.xlu1 %224 }
 0x310   :  { %v245_v40 = vmul.f32 %v2413_v15, %v2313_v24  ;;  %v2417_v41 = vpop.permute.xlu0 %222 }
 0x311   :  { %v244_v42 = vmul.f32 %v2417_v41, %v2316_v26  ;;  %2037 = vrot.lane.b32.xlu0 %v2036_v14, %s2206_s1 }
 0x313   :  { %v2041_v43 = vpack.i.bf16 %v245_v40, %v244_v42  ;;  %v2422_v44 = vpop.permute.xlu1 %228 }
 0x314   :  { %v247_v45 = vmul.f32 %v2422_v44, %v2313_v24  ;;  %v2426_v46 = vpop.permute.xlu0 %226 }
 0x315   :  { %v246_v48 = vmul.f32 %v2426_v46, %v2316_v26  ;;  %2042 = vrot.lane.b32.xlu1 %v2041_v43, %s2206_s1  ;;  %v2452_v43 = vld [vmem:[#allocation5 + $0x160] sm:$0xff] }
 0x317   :  { %v2097_v49 = vpop.eup %2096  ;;  %v2046_v50 = vpack.i.bf16 %v247_v45, %v246_v48  ;;  %v2431_v51 = vpop.permute.xlu1 %232  ;;  %v2454_v48 = vld [vmem:[#allocation5 + $0x168] sm:$0xff] }
 0x318   :  { %v2099_v52 = vpop.eup %2098  ;;  %v249_v53 = vmul.f32 %v2431_v51, %v2313_v24  ;;  %1698 = vmatprep.mubr.msk.f32.mxu0 %vm377_vm2, %v2097_v49  ;;  %v2436_v54 = vpop.permute.xlu0 %230  ;;  %v53_v24 = vld [vmem:[#allocation5 + $0x40] sm:$0xff] }
 0x319   :  { %v248_v55 = vmul.f32 %v2436_v54, %v2316_v26  ;;  %1699 = vmatmul.mubr.msk.f32.vlgmr.msra.gmra.mrb[2].mxu0 %vm377_vm2, %v2099_v52  ;;  %2047 = vrot.lane.b32.xlu0 %v2046_v50, %s2206_s1  ;;  %v2445_v61 = vpack.c.bf16 %v53_v24, %v52_v59 }
 0x31b   :  { %v2051_v56 = vpack.i.bf16 %v249_v53, %v248_v55  ;;  %1909 = vmatprep.subr.bf16.mxu1 %v2445_v61  ;;  %v2466_v55 = vld [vmem:[#allocation5 + $0xb0] ss:$0 sm:$0xff] }
 0x31c   :  { %1911 = vmatpush3.bf16.msra.mxu1 %v2445_v61 }
 0x31d   :  { %2052 = vrot.lane.b32.xlu1 %v2051_v56, %s2206_s1 }
 0x383   :  { %v2038_v62 = vpop.permute.xlu0 %2037 }
 0x384   :  { %v2040_v63 = vunpack.i.h.bf16 %v2038_v62  ;;  %v2039_v26 = vunpack.i.l.bf16 %v2038_v62 }
 0x386   :  { %v1888_v0 = vpack.c.bf16 %v2040_v63, %v2039_v26 }
 0x387   :  { %v2043_v1 = vpop.permute.xlu1 %2042 }
 0x388   :  { %v2045_v2 = vunpack.i.h.bf16 %v2043_v1  ;;  %v2044_v23 = vunpack.i.l.bf16 %v2043_v1  ;;  %1889 = vmatprep.subr.bf16.mxu0 %v1888_v0 }
 0x389   :  { %1891 = vmatpush3.bf16.msra.mxu0 %v1888_v0 }
 0x38a   :  { %v1892_v25 = vpack.c.bf16 %v2045_v2, %v2044_v23 }
 0x38b   :  { %v2048_v30 = vpop.permute.xlu0 %2047 }
 0x38c   :  { %v2050_v31 = vunpack.i.h.bf16 %v2048_v30  ;;  %v2049_v10 = vunpack.i.l.bf16 %v2048_v30  ;;  %1893 = vmatprep.subr.bf16.mxu0 %v1892_v25 }
 0x38d   :  { %1895 = vmatpush3.bf16.msra.mxu0 %v1892_v25 }
 0x38e   :  { %v1896_v33 = vpack.c.bf16 %v2050_v31, %v2049_v10 }
 0x38f   :  { %v2053_v8 = vpop.permute.xlu1 %2052 }
 0x390   :  { %v2055_v9 = vunpack.i.h.bf16 %v2053_v8  ;;  %v2054_v12 = vunpack.i.l.bf16 %v2053_v8  ;;  %1897 = vmatprep.subr.bf16.mxu0 %v1896_v33 }
 0x391   :  { %1899 = vmatpush3.bf16.msra.mxu0 %v1896_v33 }
 0x392   :  { %v1900_v35 = vpack.c.bf16 %v2055_v9, %v2054_v12 }
 0x394   :  { %1901 = vmatprep.subr.bf16.mxu0 %v1900_v35 }
 0x395   :  { %1903 = vmatpush3.bf16.msra.mxu0 %v1900_v35 }
 0x396   :  { %1913 = vmatprep.subr.bf16.mxu0 %v2258_v3 }
 0x3ec   :  { %v1700_v36 = vpop.f32.mrb[2].mxu0 }
 0x3ed   :  { %v472_v37 = vmax.f32 %v1700_v36, 1e-30  ;;  %v462_v38 = vpop.f32.mrb[3].mxu0  ;;  %v2476_v36 = vld [vmem:[#allocation5 + $0xb8] ss:$0 sm:$0xff] }
 0x3ee   :  { %v471_v13 = vmax.f32 %v462_v38, 1e-30  ;;  %v2478_v38 = vld [vmem:[#allocation5 + $0xc0] ss:$0 sm:$0xff] }
 0x3ef   :  { %2100 = vrcp.f32 %v472_v37 }
 0x3f0   :  { %2102 = vrcp.f32 %v471_v13 }
 0x3f9   :  { %v2101_v14 = vpop.eup %2100 }
 0x3fa   :  { %v2103_v40 = vpop.eup %2102  ;;  %v476_v42 = vmul.f32 %v2101_v14, %v2099_v52 }
 0x3fb   :  { %v475_v45 = vmul.f32 %v2103_v40, %v2097_v49 }
 0x3fc   :  { %v478_v53 = vmul.f32 %v476_v42, %v2454_v48 }
 0x3fd   :  { %v477_v50 = vmul.f32 %v475_v45, %v2452_v43 }
 0x3ff   :  { %1717 = vmatprep.mubr.msk.f32.mxu0 %vm377_vm2, %v477_v50 }
 0x400   :  { %1718 = vmatmul.mubr.msk.f32.vlgmr.msra.gmra.mrb[4].mxu0 %vm377_vm2, %v478_v53 }
 0x401   :  { %1915 = vmatpush3.bf16.msra.mxu0 %v2258_v3 }
 0x402   :  { %1917 = vmatprep.subr.bf16.mxu0 %v2262_v6 }
 0x405   :  { %1919 = vmatpush3.bf16.msra.mxu0 %v2262_v6 }
 0x406   :  { %1945 = vmatprep.subr.bf16.mxu0 %v2373_v4 }
 0x4d3   :  { %v1719_v52 = vpop.f32.mrb[4].mxu0 }
 0x4d4   :  { %v583_v49 = vpop.f32.mrb[5].mxu0 }
 0x4d5   :  { %1728 = vmatprep.mubr.msk.f32.mxu1 %vm96_vm0, %v583_v49 }
 0x4d6   :  { %1729 = vmatmul.mubr.msk.f32.vlgmr.msra.gmra.mrb[2].mxu1 %vm96_vm0, %v1719_v52 }
 0x5a9   :  { %v1730_v56 = vpop.f32.mrb[2].mxu1 }
 0x5aa   :  { %v674_v57 = vadd.f32 %v1730_v56, %v2466_v55  ;;  %v668_v58 = vpop.f32.mrb[3].mxu1 }
 0x5ab   :  { %v669_v3 = vadd.f32 %v2466_v55, %v668_v58 }
 0x5ac   :  { %v678_v59 = vadd.f32 %v674_v57, %v2281_v11 }
 0x5ad   :  { %v677_v6 = vadd.f32 %v669_v3, %v2260_v5 }
 0x5ae   :  { %v682_v24 = vsel %vm96_vm0, %v678_v59, 0.0 }
 0x5af   :  { %683 = vadd.xlane.f32.xlu1 %v682_v24  ;;  %v679_v62 = vsel %vm96_vm0, %v677_v6, 0.0 }
 0x5b0   :  { %680 = vadd.xlane.f32.xlu0 %v679_v62 }
 0x63c   :  { %v684_v63 = vpop.xlane.xlu1 %683 }
 0x63d   :  { %v687_v26 = vmul.f32 0.03125, %v684_v63  ;;  %v681_v0 = vpop.xlane.xlu0 %680 }
 0x63e   :  { %v686_v1 = vmul.f32 0.03125, %v681_v0 }
 0x63f   :  { %v689_v2 = vsub.f32 %v678_v59, %v687_v26 }
 0x640   :  { %v688_v23 = vsub.f32 %v677_v6, %v686_v1 }
 0x641   :  { %v691_v31 = vmul.f32 %v689_v2, %v689_v2 }
 0x642   :  { %v690_v25 = vmul.f32 %v688_v23, %v688_v23 }
 0x643   :  { %v695_v11 = vsel %vm96_vm0, %v691_v31, 0.0 }
 0x644   :  { %v692_v30 = vsel %vm96_vm0, %v690_v25, 0.0 }
 0x645   :  { %693 = vadd.xlane.f32.xlu0 %v692_v30 }
 0x649   :  { %696 = vadd.xlane.f32.xlu0 %v695_v11 }
 0x6d2   :  { %v694_v5 = vpop.xlane.xlu0 %693 }
 0x6d3   :  { %v698_v10 = vmul.f32 0.03125, %v694_v5 }
 0x6d5   :  { %v700_v33 = vadd.f32 1e-12, %v698_v10 }
 0x6d6   :  { %v697_v8 = vpop.xlane.xlu0 %696 }
 0x6d7   :  { %2104 = vrsqrt.f32 %v700_v33  ;;  %v699_v9 = vmul.f32 0.03125, %v697_v8 }
 0x6d9   :  { %v701_v12 = vadd.f32 1e-12, %v699_v9 }
 0x6db   :  { %2106 = vrsqrt.f32 %v701_v12 }
 0x6e1   :  { %v2105_v35 = vpop.eup %2104 }
 0x6e2   :  { %v704_v37 = vmul.f32 %v2105_v35, %v688_v23 }
 0x6e4   :  { %v710_v13 = vmul.f32 %v2476_v36, %v704_v37 }
 0x6e5   :  { %v2107_v14 = vpop.eup %2106 }
 0x6e6   :  { %v705_v40 = vmul.f32 %v2107_v14, %v689_v2  ;;  %v2482_v42 = vadd.f32 %v2478_v38, %v710_v13 }
 0x6e8   :  { %1739 = vmatprep.mubr.msk.f32.mxu0 %vm96_vm0, %v2482_v42  ;;  %v711_v45 = vmul.f32 %v2476_v36, %v705_v40 }
 0x6ea   :  { %v2488_v50 = vadd.f32 %v2478_v38, %v711_v45 }
 0x6ec   :  { %1740 = vmatmul.mubr.msk.f32.vlgmr.msra.gmra.mrb[6].mxu0 %vm96_vm0, %v2488_v50 }
 0x6ed   :  { %1947 = vmatpush3.bf16.msra.mxu0 %v2373_v4 }
 0x6ee   :  { %1949 = vmatprep.subr.bf16.mxu0 %v2379_v29 }
 0x6f1   :  { %1951 = vmatpush3.bf16.msra.mxu0 %v2379_v29 }
 0x6f2   :  { %1953 = vmatprep.subr.bf16.mxu0 %v2385_v32 }
 0x6f5   :  { %1955 = vmatpush3.bf16.msra.mxu0 %v2385_v32 }
 0x6f6   :  { %1957 = vmatprep.subr.bf16.mxu0 %v2393_v34 }
 0x6f9   :  { %1959 = vmatpush3.bf16.msra.mxu0 %v2393_v34 }
 0x7bf   :  { %v1741_v53 = vpop.f32.mrb[6].mxu0 }
 0x7c0   :  { %v2500_v52 = vadd.f32 %v1741_v53, %v2310_v22  ;;  %v790_v49 = vpop.f32.mrb[7].mxu0 }
 0x7c1   :  { %v2503_v56 = vadd.f32 %v2310_v22, %v790_v49 }
 0x7c2   :  { %v802_v4 = vmul.f32 %v2500_v52, %v2302_v18  ;;  %v800_v29 = vmul.f32 %v2500_v52, %v2304_v19  ;;  %v804_v18 = vmul.f32 %v2500_v52, %v2306_v20  ;;  %v810_v33 = vmul.f32 %v2500_v52, %v2413_v15 }
 0x7c3   :  { %1758 = vmatprep.mubr.msk.f32.mxu1 %vm96_vm0, %v2503_v56  ;;  %v801_v32 = vmul.f32 %v2503_v56, %v2298_v16  ;;  %v799_v34 = vmul.f32 %v2503_v56, %v2300_v17  ;;  %v803_v22 = vmul.f32 %v2503_v56, %v2308_v21  ;;  %v805_v3 = vmul.f32 %v2503_v56, %v2320_v28 }
 0x7c4   :  { %v806_v16 = vmul.f32 %v2500_v52, %v2318_v27  ;;  %v809_v47 = vmul.f32 %v2503_v56, %v2417_v41  ;;  %v807_v9 = vmul.f32 %v2503_v56, %v2409_v39  ;;  %v808_v12 = vmul.f32 %v2500_v52, %v2405_v7 }
 0x7c5   :  { %v2061_v57 = vpack.i.bf16 %v802_v4, %v801_v32  ;;  %v2056_v58 = vpack.i.bf16 %v800_v29, %v799_v34  ;;  %v2066_v19 = vpack.i.bf16 %v804_v18, %v803_v22  ;;  %v811_v15 = vmul.f32 %v2503_v56, %v2426_v46 }
 0x7c6   :  { %v2071_v17 = vpack.i.bf16 %v806_v16, %v805_v3  ;;  %v2081_v8 = vpack.i.bf16 %v810_v33, %v809_v47  ;;  %v2076_v41 = vpack.i.bf16 %v808_v12, %v807_v9  ;;  %v56_v9 = vld [vmem:[#allocation5 + $0x50] sm:$0xff]  ;;  %v57_v12 = vld [vmem:[#allocation5 + $0x58] sm:$0xff] }
 0x7c7   :  { %2062 = vrot.lane.b32.xlu0 %v2061_v57, %s2205_s10  ;;  %2057 = vrot.lane.b32.xlu1 %v2056_v58, %s2205_s10 }
 0x7cb   :  { %2067 = vrot.lane.b32.xlu1 %v2066_v19, %s2205_s10 }
 0x7cf   :  { %2072 = vrot.lane.b32.xlu1 %v2071_v17, %s2205_s10 }
 0x839   :  { %v2063_v21 = vpop.permute.xlu0 %2062  ;;  %v2058_v59 = vpop.permute.xlu1 %2057 }
 0x83a   :  { %v2065_v6 = vunpack.i.h.bf16 %v2063_v21  ;;  %v2064_v20 = vunpack.i.l.bf16 %v2063_v21  ;;  %v2060_v24 = vunpack.i.h.bf16 %v2058_v59  ;;  %v2059_v62 = vunpack.i.l.bf16 %v2058_v59 }
 0x83c   :  { %v1920_v63 = vpack.c.bf16 %v2060_v24, %v2059_v62  ;;  %v1926_v26 = vpack.c.bf16 %v2065_v6, %v2064_v20 }
 0x83d   :  { %v2068_v28 = vpop.permute.xlu1 %2067 }
 0x83e   :  { %1922 = vmatprep.subr.msk.bf16.mxu1 %vm2346_vm1, %v1920_v63  ;;  %v2070_v27 = vunpack.i.h.bf16 %v2068_v28  ;;  %v2069_v0 = vunpack.i.l.bf16 %v2068_v28 }
 0x83f   :  { %1925 = vmatpush3.bf16.xpose.msk.msra.mxu1 %vm2346_vm1, %v1920_v63 }
 0x840   :  { %1928 = vmatprep.subr.msk.bf16.mxu1 %vm2346_vm1, %v1926_v26  ;;  %v1932_v1 = vpack.c.bf16 %v2070_v27, %v2069_v0 }
 0x841   :  { %v2073_v2 = vpop.permute.xlu1 %2072 }
 0x842   :  { %v2075_v23 = vunpack.i.h.bf16 %v2073_v2  ;;  %v2074_v25 = vunpack.i.l.bf16 %v2073_v2 }
 0x844   :  { %v1938_v30 = vpack.c.bf16 %v2075_v23, %v2074_v25 }
 0x847   :  { %1931 = vmatpush3.bf16.xpose.msk.msra.mxu1 %vm2346_vm1, %v1926_v26 }
 0x848   :  { %1934 = vmatprep.subr.msk.bf16.mxu1 %vm2346_vm1, %v1932_v1 }
 0x84f   :  { %1937 = vmatpush3.bf16.xpose.msk.msra.mxu1 %vm2346_vm1, %v1932_v1 }
 0x850   :  { %1940 = vmatprep.subr.msk.bf16.mxu1 %vm2346_vm1, %v1938_v30 }
 0x857   :  { %1943 = vmatpush3.bf16.xpose.msk.msra.mxu1 %vm2346_vm1, %v1938_v30 }
 0x858   :  { %1977 = vmatprep.subr.bf16.mxu1 %v2443_v60 }
 0x85e   :  { %1759 = vmatmul.mubr.msk.f32.vlgmr.msra.gmra.mrb[4].mxu1 %vm96_vm0, %v2500_v52 }
 0x85f   :  { %1979 = vmatpush3.bf16.msra.mxu1 %v2443_v60  ;;  %v813_v60 = vmul.f32 %v2503_v56, %v2436_v54  ;;  %v812_v54 = vmul.f32 %v2500_v52, %v2422_v44 }
 0x860   :  { %1981 = vmatprep.subr.bf16.mxu1 %v2445_v61 }
 0x863   :  { %1983 = vmatpush3.bf16.msra.mxu1 %v2445_v61  ;;  %v814_v61 = vmul.f32 %v2500_v52, %v2431_v51  ;;  %v2086_v51 = vpack.i.bf16 %v812_v54, %v811_v15 }
 0x865   :  { %v2091_v35 = vpack.i.bf16 %v814_v61, %v813_v60 }
 0x931   :  { %v1760_v31 = vpop.f32.mrb[4].mxu1 }
 0x932   :  { %v927_v11 = vpop.f32.mrb[5].mxu1  ;;  %v939_v5 = vsel %vm377_vm2, %v1760_v31, -inf }
 0x933   :  { %940 = vmax.xlane.f32.xlu1 %v939_v5  ;;  %v936_v10 = vsel %vm377_vm2, %v927_v11, -inf }
 0x934   :  { %937 = vmax.xlane.f32.xlu0 %v936_v10 }
 0x944   :  { %2082 = vrot.lane.b32.xlu1 %v2081_v8, %s2206_s1 }
 0x948   :  { %2092 = vrot.lane.b32.xlu1 %v2091_v35, %s2206_s1 }
 0x94a   :  { %2077 = vrot.lane.b32.xlu0 %v2076_v41, %s2206_s1  ;;  %v58_v41 = vld [vmem:[#allocation5 + $0x60] sm:$0xff] }
 0x94b   :  { %v1988_v15 = vpack.c.bf16 %v58_v41, %v57_v12 }
 0x94e   :  { %2087 = vrot.lane.b32.xlu0 %v2086_v51, %s2206_s1 }
 0x9c0   :  { %v941_v37 = vpop.xlane.xlu1 %940 }
 0x9c1   :  { %v943_v39 = vsub.f32 %v1760_v31, %v941_v37  ;;  %v938_v13 = vpop.xlane.xlu0 %937 }
 0x9c2   :  { %v942_v14 = vsub.f32 %v927_v11, %v938_v13 }
 0x9c3   :  { %v946_v7 = vmul.f32 1.442695, %v943_v39 }
 0x9c4   :  { %v944_v40 = vmul.f32 1.442695, %v942_v14  ;;  %v2083_v56 = vpop.permute.xlu1 %2082 }
 0x9c5   :  { %v2078_v45 = vpop.permute.xlu0 %2077  ;;  %v2085_v44 = vunpack.i.h.bf16 %v2083_v56  ;;  %v2084_v52 = vunpack.i.l.bf16 %v2083_v56 }
 0x9c6   :  { %2108 = vpow2.f32 %v944_v40  ;;  %v2080_v53 = vunpack.i.h.bf16 %v2078_v45  ;;  %v2079_v49 = vunpack.i.l.bf16 %v2078_v45 }
 0x9c7   :  { %2110 = vpow2.f32 %v946_v7  ;;  %v1964_v34 = vpack.c.bf16 %v2085_v44, %v2084_v52  ;;  %v60_v52 = vld [vmem:[#allocation5 + $0x70] sm:$0xff] }
 0x9c8   :  { %v1960_v46 = vpack.c.bf16 %v2080_v53, %v2079_v49  ;;  %v2093_v22 = vpop.permute.xlu1 %2092 }
 0x9c9   :  { %v2088_v4 = vpop.permute.xlu0 %2087  ;;  %v2095_v18 = vunpack.i.h.bf16 %v2093_v22  ;;  %v2094_v19 = vunpack.i.l.bf16 %v2093_v22  ;;  %v65_v22 = vld [vmem:[#allocation5 + $0x98] sm:$0xff] }
 0x9ca   :  { %1961 = vmatprep.subr.bf16.mxu0 %v1960_v46  ;;  %v2090_v57 = vunpack.i.h.bf16 %v2088_v4  ;;  %v2089_v58 = vunpack.i.l.bf16 %v2088_v4  ;;  %v61_v4 = vld [vmem:[#allocation5 + $0x78] sm:$0xff] }
 0x9cb   :  { %v1972_v16 = vpack.c.bf16 %v2095_v18, %v2094_v19  ;;  %v66_v19 = vld [vmem:[#allocation5 + $0xa0] sm:$0xff] }
 0x9cc   :  { %v1968_v3 = vpack.c.bf16 %v2090_v57, %v2089_v58  ;;  %v64_v58 = vld [vmem:[#allocation5 + $0x90] sm:$0xff] }
 0x9cd   :  { %v2000_v18 = vpack.c.bf16 %v65_v22, %v64_v58 }
 0x9d0   :  { %v2109_v29 = vpop.eup %2108 }
 0x9d1   :  { %v2111_v32 = vpop.eup %2110  ;;  %1777 = vmatprep.mubr.msk.f32.mxu0 %vm377_vm2, %v2109_v29 }
 0x9d2   :  { %1778 = vmatmul.mubr.msk.f32.vlgmr.msra.gmra.mrb[8].mxu0 %vm377_vm2, %v2111_v32 }
 0x9d3   :  { %1963 = vmatpush3.bf16.msra.mxu0 %v1960_v46 }
 0x9d4   :  { %1965 = vmatprep.subr.bf16.mxu0 %v1964_v34 }
 0x9d7   :  { %1967 = vmatpush3.bf16.msra.mxu0 %v1964_v34  ;;  %v63_v34 = vld [vmem:[#allocation5 + $0x88] sm:$0xff] }
 0x9d8   :  { %1969 = vmatprep.subr.bf16.mxu0 %v1968_v3 }
 0x9db   :  { %1971 = vmatpush3.bf16.msra.mxu0 %v1968_v3  ;;  %v1544_v3 = vld [vmem:[#allocation5 + $0x68] ss:$0 sm:$0xff] }
 0x9dc   :  { %1973 = vmatprep.subr.bf16.mxu0 %v1972_v16 }
 0x9df   :  { %1975 = vmatpush3.bf16.msra.mxu0 %v1972_v16 }
 0xaa5   :  { %v1779_v17 = vpop.f32.mrb[8].mxu0 }
 0xaa6   :  { %v1030_v21 = vmax.f32 %v1779_v17, 1e-30  ;;  %v1020_v59 = vpop.f32.mrb[9].mxu0 }
 0xaa7   :  { %v1029_v6 = vmax.f32 %v1020_v59, 1e-30 }
 0xaa8   :  { %2112 = vrcp.f32 %v1030_v21 }
 0xaa9   :  { %2114 = vrcp.f32 %v1029_v6 }
 0xab2   :  { %v2113_v20 = vpop.eup %2112 }
 0xab3   :  { %v2115_v24 = vpop.eup %2114  ;;  %v1034_v62 = vmul.f32 %v2113_v20, %v2111_v32  ;;  %v62_v32 = vld [vmem:[#allocation5 + $0x80] sm:$0xff] }
 0xab4   :  { %v1033_v63 = vmul.f32 %v2115_v24, %v2109_v29  ;;  %v1992_v29 = vpack.c.bf16 %v61_v4, %v60_v52  ;;  %v1996_v57 = vpack.c.bf16 %v63_v34, %v62_v32 }
 0xab5   :  { %v1036_v28 = vmul.f32 %v1034_v62, %v2454_v48 }
 0xab6   :  { %v1035_v26 = vmul.f32 %v1033_v63, %v2452_v43  ;;  %1993 = vmatprep.subr.bf16.mxu1 %v1992_v29 }
 0xab8   :  { %1796 = vmatprep.mubr.msk.f32.mxu0 %vm377_vm2, %v1035_v26 }
 0xab9   :  { %1797 = vmatmul.mubr.msk.f32.vlgmr.msra.gmra.mrb[10].mxu0 %vm377_vm2, %v1036_v28 }
 0xb8c   :  { %v1798_v27 = vpop.f32.mrb[10].mxu0 }
 0xb8d   :  { %v1141_v0 = vpop.f32.mrb[11].mxu0 }
 0xb8e   :  { %1807 = vmatprep.mubr.msk.f32.mxu1 %vm96_vm0, %v1141_v0 }
 0xb8f   :  { %1808 = vmatmul.mubr.msk.f32.vlgmr.msra.gmra.mrb[6].mxu1 %vm96_vm0, %v1798_v27 }
 0xb90   :  { %1995 = vmatpush3.bf16.msra.mxu1 %v1992_v29 }
 0xb91   :  { %1997 = vmatprep.subr.bf16.mxu1 %v1996_v57 }
 0xb94   :  { %1999 = vmatpush3.bf16.msra.mxu1 %v1996_v57 }
 0xb95   :  { %2001 = vmatprep.subr.bf16.mxu1 %v2000_v18 }
 0xb98   :  { %2003 = vmatpush3.bf16.msra.mxu1 %v2000_v18 }
 0xc62   :  { %v1809_v1 = vpop.f32.mrb[6].mxu1 }
 0xc63   :  { %v1228_v2 = vadd.f32 %v1809_v1, %v2466_v55  ;;  %v1222_v23 = vpop.f32.mrb[7].mxu1 }
 0xc64   :  { %v1223_v25 = vadd.f32 %v2466_v55, %v1222_v23 }
 0xc65   :  { %v1232_v43 = vadd.f32 %v1228_v2, %v2488_v50  ;;  %v1547_v2 = vld [vmem:[#allocation5 + $0xc8] ss:$0 sm:$0xff] }
 0xc66   :  { %v1231_v48 = vadd.f32 %v1223_v25, %v2482_v42  ;;  %v55_v42 = vld [vmem:[#allocation5 + $0x48] sm:$0xff] }
 0xc67   :  { %v1236_v30 = vsel %vm96_vm0, %v1232_v43, 0.0  ;;  %v1984_v35 = vpack.c.bf16 %v56_v9, %v55_v42 }
 0xc68   :  { %1237 = vadd.xlane.f32.xlu1 %v1236_v30  ;;  %v1233_v31 = vsel %vm96_vm0, %v1231_v48, 0.0 }
 0xc69   :  { %1234 = vadd.xlane.f32.xlu0 %v1233_v31  ;;  %1985 = vmatprep.subr.bf16.mxu0 %v1984_v35 }
 0xc6a   :  { %1987 = vmatpush3.bf16.msra.mxu0 %v1984_v35 }
 0xc6b   :  { %1989 = vmatprep.subr.bf16.mxu0 %v1988_v15 }
 0xc6e   :  { %1991 = vmatpush3.bf16.msra.mxu0 %v1988_v15 }
 0xcf5   :  { %v1238_v11 = vpop.xlane.xlu1 %1237 }
 0xcf6   :  { %v1240_v5 = vmul.f32 0.03125, %v1238_v11  ;;  %v1235_v10 = vpop.xlane.xlu0 %1234 }
 0xcf7   :  { %v1239_v47 = vmul.f32 0.03125, %v1235_v10 }
 0xcf8   :  { %v1242_v33 = vsub.f32 %v1232_v43, %v1240_v5 }
 0xcf9   :  { %v1241_v8 = vsub.f32 %v1231_v48, %v1239_v47 }
 0xcfa   :  { %v1244_v55 = vmul.f32 %v1242_v33, %v1242_v33 }
 0xcfb   :  { %v1243_v60 = vmul.f32 %v1241_v8, %v1241_v8 }
 0xcfc   :  { %v1248_v50 = vsel %vm96_vm0, %v1244_v55, 0.0 }
 0xcfd   :  { %v1245_v61 = vsel %vm96_vm0, %v1243_v60, 0.0 }
 0xcfe   :  { %1246 = vadd.xlane.f32.xlu0 %v1245_v61 }
 0xd02   :  { %1249 = vadd.xlane.f32.xlu0 %v1248_v50 }
 0xd8b   :  { %v1247_v54 = vpop.xlane.xlu0 %1246 }
 0xd8c   :  { %v1251_v51 = vmul.f32 0.03125, %v1247_v54 }
 0xd8e   :  { %v1253_v37 = vadd.f32 1e-12, %v1251_v51 }
 0xd8f   :  { %v1250_v39 = vpop.xlane.xlu0 %1249 }
 0xd90   :  { %2116 = vrsqrt.f32 %v1253_v37  ;;  %v1252_v13 = vmul.f32 0.03125, %v1250_v39  ;;  %v1550_v39 = vld [vmem:[#allocation5 + $0xd0] ss:$0 sm:$0xff] }
 0xd92   :  { %v1254_v14 = vadd.f32 1e-12, %v1252_v13 }
 0xd94   :  { %2118 = vrsqrt.f32 %v1254_v14 }
 0xd9a   :  { %v2117_v7 = vpop.eup %2116 }
 0xd9b   :  { %v1257_v40 = vmul.f32 %v2117_v7, %v1241_v8 }
 0xd9d   :  { %v1259_v45 = vmul.f32 %v2476_v36, %v1257_v40  ;;  %v1551_v40 = vld [vmem:[#allocation5 + $0xd8] ss:$0 sm:$0xff] }
 0xd9e   :  { %v2119_v53 = vpop.eup %2118 }
 0xd9f   :  { %v1258_v49 = vmul.f32 %v2119_v53, %v1242_v33  ;;  %v1261_v46 = vadd.f32 %v2478_v38, %v1259_v45 }
 0xda1   :  { %1818 = vmatprep.mubr.msk.f32.mxu0 %vm96_vm0, %v1261_v46  ;;  %v1260_v56 = vmul.f32 %v2476_v36, %v1258_v49  ;;  %v67_v36 = vld [vmem:[#allocation5 + $0xa8] sm:$0xff] }
 0xda3   :  { %v1262_v44 = vadd.f32 %v2478_v38, %v1260_v56  ;;  %v2004_v38 = vpack.c.bf16 %v67_v36, %v66_v19 }
 0xda5   :  { %1819 = vmatmul.mubr.msk.f32.vlgmr.msra.gmra.mrb[12].mxu0 %vm96_vm0, %v1262_v44  ;;  %2005 = vmatprep.subr.bf16.mxu1 %v2004_v38 }
 0xda6   :  { %2007 = vmatpush3.bf16.msra.mxu1 %v2004_v38 }
 0xe78   :  { %v1820_v16 = vpop.f32.mrb[12].mxu0 }
 0xe79   :  { %v1345_v17 = vadd.f32 %v1820_v16, %v1544_v3  ;;  %v1339_v21 = vpop.f32.mrb[13].mxu0 }
 0xe7a   :  { %v1340_v59 = vadd.f32 %v1544_v3, %v1339_v21 }
 0xe7b   :  { %v1351_v6 = vmul.f32 0.70710677, %v1345_v17  ;;  %v1349_v27 = vmul.f32 0.5, %v1345_v17 }
 0xe7c   :  { %v1350_v20 = vmul.f32 0.70710677, %v1340_v59  ;;  %v1348_v26 = vmul.f32 0.5, %v1340_v59 }
 0xe7d   :  { %2120 = verf.f32 %v1351_v6 }
 0xe7e   :  { %2122 = verf.f32 %v1350_v20 }
 0xe87   :  { %v2121_v24 = vpop.eup %2120 }
 0xe88   :  { %v2123_v62 = vpop.eup %2122  ;;  %v1355_v63 = vadd.f32 1.0, %v2121_v24 }
 0xe89   :  { %v1354_v28 = vadd.f32 1.0, %v2123_v62 }
 0xe8a   :  { %v1357_v1 = vmul.f32 %v1355_v63, %v1349_v27 }
 0xe8b   :  { %v1356_v0 = vmul.f32 %v1354_v28, %v1348_v26 }
 0xe8d   :  { %1837 = vmatprep.mubr.msk.f32.mxu1 %vm377_vm2, %v1356_v0 }
 0xe8e   :  { %1838 = vmatmul.mubr.msk.f32.vlgmr.msra.gmra.mrb[8].mxu1 %vm377_vm2, %v1357_v1 }
 0xf61   :  { %v1839_v23 = vpop.f32.mrb[8].mxu1 }
 0xf62   :  { %v1440_v25 = vadd.f32 %v1839_v23, %v1547_v2  ;;  %v1434_v43 = vpop.f32.mrb[9].mxu1 }
 0xf63   :  { %v1435_v48 = vadd.f32 %v1547_v2, %v1434_v43 }
 0xf64   :  { %v1444_v30 = vadd.f32 %v1440_v25, %v1262_v44 }
 0xf65   :  { %v1443_v31 = vadd.f32 %v1435_v48, %v1261_v46 }
 0xf66   :  { %v1448_v11 = vsel %vm96_vm0, %v1444_v30, 0.0 }
 0xf67   :  { %1449 = vadd.xlane.f32.xlu0 %v1448_v11  ;;  %v1445_v5 = vsel %vm96_vm0, %v1443_v31, 0.0 }
 0xf68   :  { %1446 = vadd.xlane.f32.xlu1 %v1445_v5 }
 0xff4   :  { %v1450_v10 = vpop.xlane.xlu0 %1449 }
 0xff5   :  { %v1452_v47 = vmul.f32 0.03125, %v1450_v10  ;;  %v1447_v33 = vpop.xlane.xlu1 %1446 }
 0xff6   :  { %v1451_v8 = vmul.f32 0.03125, %v1447_v33 }
 0xff7   :  { %v1454_v60 = vsub.f32 %v1444_v30, %v1452_v47 }
 0xff8   :  { %v1453_v61 = vsub.f32 %v1443_v31, %v1451_v8 }
 0xff9   :  { %v1456_v55 = vmul.f32 %v1454_v60, %v1454_v60 }
 0xffa   :  { %v1455_v50 = vmul.f32 %v1453_v61, %v1453_v61 }
 0xffb   :  { %v1460_v42 = vsel %vm96_vm0, %v1456_v55, 0.0 }
 0xffc   :  { %1461 = vadd.xlane.f32.xlu0 %v1460_v42  ;;  %v1457_v9 = vsel %vm96_vm0, %v1455_v50, 0.0 }
 0xffd   :  { %1458 = vadd.xlane.f32.xlu1 %v1457_v9 }
0x1089   :  { %v1462_v12 = vpop.xlane.xlu0 %1461 }
0x108a   :  { %v1464_v35 = vmul.f32 0.03125, %v1462_v12  ;;  %v1459_v41 = vpop.xlane.xlu1 %1458 }
0x108b   :  { %v1463_v15 = vmul.f32 0.03125, %v1459_v41 }
0x108c   :  { %v1466_v54 = vadd.f32 1e-12, %v1464_v35 }
0x108d   :  { %v1465_v51 = vadd.f32 1e-12, %v1463_v15 }
0x108e   :  { %2124 = vrsqrt.f32 %v1466_v54 }
0x108f   :  { %2126 = vrsqrt.f32 %v1465_v51 }
0x1098   :  { %v2125_v37 = vpop.eup %2124 }
0x1099   :  { %v2127_v13 = vpop.eup %2126  ;;  %v1470_v14 = vmul.f32 %v2125_v37, %v1454_v60 }
0x109a   :  { %v1469_v7 = vmul.f32 %v2127_v13, %v1453_v61 }
0x109b   :  { %v1476_v45 = vmul.f32 %v1550_v39, %v1470_v14 }
0x109c   :  { %v1475_v53 = vmul.f32 %v1550_v39, %v1469_v7 }
0x109d   :  { %v1482_v49 = vadd.f32 %v1551_v40, %v1476_v45 }
0x109e   :  { %v1481_v46 = vadd.f32 %v1551_v40, %v1475_v53 }
0x109f   :  { %1484 = vst.msk [vmem:[#allocation7 + $0x8] sm:$0xff] %vm96_vm0, %v1482_v49 }
0x10a0   :  { %1483 = vst.msk [vmem:[#allocation7] sm:$0xff] %vm96_vm0, %v1481_v46 }
0x10a1   :  { %2183 = shalt.err (!%p2180_p6)
}
0x10a2   :  { %s2184_s18 = scalar_lea.hbm %s2619_s3, 256 }
0x10a3   :  { %p2185_p7 = scmp.ne.s32.totalorder %s2619_s3, %s2184_s18  ;;  %p2188_p8 = scmp.lt.u32.totalorder %s2184_s18, %s2619_s3 }
0x10a5   :  { %p2190_p9 = pnand %p2188_p8, %p2185_p7 }
0x10a7   :  { %2193 = shalt.err (!%p2190_p9)
}
0x10a8   :  { %1496 = dma.vmem_to_hbm [thread:$0]  %s1491_s14, 256, %s2619_s3, [#allocation4], %s2201_s22, %s2201_s22, %s2202_s23  }
0x10a9   :  { %2198 = dma.done.wait [#allocation4], 256  }
0x10aa   :  { %2199 = vsyncadd [#allocation4], 4294967040 }
0x10ab   :  { %1500 = vsyncpa [#allocation3], 1 }
0x10ac   :  { %1501 = vsyncpa [#allocation6], 1 }
0x10ad   :  { %1502 = vsyncpa [#allocation4], 1 }

</bundles_post_ra>
